<compile_context>
chip_gen: v6e
topology: v6e:2x2x1
jax: 0.10.0
libtpu: 0.0.40
codegen_flags: <defaults>
</compile_context>

<pallas_src>
import jax
import jax.numpy as jnp
from jax import lax
from jax.experimental import pallas as pl
from jax.experimental.pallas import tpu as pltpu

_LANE = 128
_SUBLANE = 8


def _round_up(n, m):
    return ((n + m - 1) // m) * m


def _cdiv(a, b):
    return (a + b - 1) // b


def _gelu(h, mode):
    if mode == "tanh":
        # One EUP tanh + a few VPU ops (cheap path for v6e/v7x).
        c = jnp.float32(0.7978845608028654)  # sqrt(2/pi)
        return 0.5 * h * (1.0 + jnp.tanh(c * (h + 0.044715 * h * h * h)))
    # Exact erf form -- matches PyTorch nn.GELU() default.
    return 0.5 * h * (1.0 + lax.erf(h * jnp.float32(0.7071067811865476)))


def _layernorm_no_affine(x, d_real, needs_mask):
    """LayerNorm statistics over the real features (eps=1e-5, biased variance).

    gamma/beta are folded into w1/b1 by the wrapper, so only the normalization
    happens in-kernel. Padded feature columns are zero so the mean is exact; the
    centered value is re-masked so the variance stays exact too.
    """
    inv_d = 1.0 / float(d_real)
    mean = jnp.sum(x, axis=-1, keepdims=True) * inv_d
    xc = x - mean
    if needs_mask:
        col = lax.broadcasted_iota(jnp.int32, x.shape, 1)
        xc = jnp.where(col < d_real, xc, 0.0)
    var = jnp.sum(xc * xc, axis=-1, keepdims=True) * inv_d
    return xc * lax.rsqrt(var + 1e-5)


def _make_single_pass_kernel(d_real, d_pad, compute_dtype, gelu_mode):
    """Weights fully resident in VMEM; one pass per row tile."""
    needs_mask = d_real != d_pad

    def kernel(x_ref, w1_ref, b1_ref, w2_ref, b2_ref, o_ref):
        x = x_ref[...].astype(jnp.float32)                       # (TM, D_pad)
        xn = _layernorm_no_affine(x, d_real, needs_mask)
        h = jnp.dot(xn.astype(compute_dtype), w1_ref[...],
                    preferred_element_type=jnp.float32) + b1_ref[...]
        h = _gelu(h, gelu_mode)
        y = jnp.dot(h.astype(compute_dtype), w2_ref[...],
                    preferred_element_type=jnp.float32) + b2_ref[...]
        o_ref[...] = (y + x).astype(o_ref.dtype)

    return kernel


def _make_h_tiled_kernel(d_real, d_pad, compute_dtype, gelu_mode):
    """Hidden dim streamed in column tiles; (TM, D_pad) f32 accumulator in scratch."""
    needs_mask = d_real != d_pad

    def kernel(x_ref, w1_ref, b1_ref, w2_ref, b2_ref, o_ref, acc_ref, xn_ref):
        k = pl.program_id(1)

        @pl.when(k == 0)
        def _():
            x = x_ref[...].astype(jnp.float32)
            xn_ref[...] = _layernorm_no_affine(x, d_real, needs_mask).astype(xn_ref.dtype)
            acc_ref[...] = jnp.zeros_like(acc_ref)

        h = jnp.dot(xn_ref[...], w1_ref[...],
                    preferred_element_type=jnp.float32) + b1_ref[...]
        h = _gelu(h, gelu_mode)
        acc_ref[...] += jnp.dot(h.astype(compute_dtype), w2_ref[...],
                                preferred_element_type=jnp.float32)

        @pl.when(k == pl.num_programs(1) - 1)
        def _():
            o_ref[...] = (acc_ref[...] + b2_ref[...]
                          + x_ref[...].astype(jnp.float32)).astype(o_ref.dtype)

    return kernel


def feedforward_pallas(x, gamma, beta, w1, b1, w2, b2, *,
                       compute_dtype=jnp.bfloat16, block_rows=512,
                       hidden_block=None, gelu_mode="erf"):
    """FeedForward: y = Linear2(GELU(Linear1(LayerNorm(x)))) + x.

    x: (B, S, D). w1: (D, H), w2: (H, D); y = x @ w + b convention. The LayerNorm
    affine (gamma/beta) is folded into w1/b1 in the wrapper.
    """
    B, S, D = x.shape
    H = w1.shape[1]
    N = B * S
    out_dtype = x.dtype
    x_isize = jnp.dtype(x.dtype).itemsize
    o_isize = jnp.dtype(out_dtype).itemsize
    wt_isize = jnp.dtype(compute_dtype).itemsize

    # ---- Fold LayerNorm affine into the first linear layer (tiny, once per call). ----
    gamma_f = jnp.asarray(gamma, jnp.float32).reshape(-1)
    beta_f = jnp.asarray(beta, jnp.float32).reshape(-1)
    w1_f = jnp.asarray(w1, jnp.float32)
    w1_eff = w1_f * gamma_f[:, None]                                  # (D, H)
    b1_eff = jnp.asarray(b1, jnp.float32).reshape(-1) + beta_f @ w1_f  # (H,)
    b2_f = jnp.asarray(b2, jnp.float32).reshape(-1)

    # ---- Per-generation VMEM budget (v5e/v6e: 128 MiB, v7x: 64 MiB per core). ----
    try:
        vmem_cap = int(pltpu.get_tpu_info().vmem_capacity_bytes)
    except Exception:
        vmem_cap = 64 * 1024 * 1024                                   # conservative (v7x)
    budget = max(vmem_cap - 8 * 1024 * 1024, 16 * 1024 * 1024)

    # ---- Hidden-dim tiling: weights resident when they fit, streamed otherwise. ----
    D_pad = _round_up(D, _LANE)
    H_pad0 = _round_up(H, _LANE)
    if hidden_block is not None:
        TH = min(_round_up(int(hidden_block), _LANE), H_pad0)
    else:
        full_w_bytes = 2 * D_pad * H_pad0 * wt_isize
        if full_w_bytes <= budget // 3:
            TH = H_pad0                                               # fully resident
        else:
            # Two weight slabs per step, double-buffered -> 4 * D_pad * TH * wt_isize.
            TH = (budget // 3) // (4 * D_pad * wt_isize)
            TH = min(max(_LANE, (TH // _LANE) * _LANE), H_pad0)
    H_pad = _round_up(H, TH)
    KT = H_pad // TH

    # ---- Row tiling: sublane-aligned, >= 2 tiles for megacore, sized to the budget. ----
    TM = _round_up(min(int(block_rows), N), _SUBLANE)
    if N > _SUBLANE:
        TM = min(TM, _round_up(_cdiv(N, 2), _SUBLANE))

    def _footprint(tm, wbuf):
        b = 2 * tm * D_pad * x_isize                                  # x tile (2 bufs)
        b += 2 * tm * D_pad * o_isize                                 # out tile (2 bufs)
        b += wbuf * 2 * D_pad * TH * wt_isize                         # w1 / w2 tiles
        b += wbuf * TH * 4 + D_pad * 4                                # b1 / b2
        if KT > 1:
            b += tm * D_pad * (4 + wt_isize)                          # acc + cached LN(x)
        b += tm * D_pad * 4 + tm * TH * (4 + wt_isize)                # live temporaries
        return b

    fit_wbuf = 1 if KT == 1 else 2
    while TM > _SUBLANE and _footprint(TM, fit_wbuf) > budget:
        TM = _round_up(TM // 2, _SUBLANE)
    vmem_limit = int(min(vmem_cap, max(int(_footprint(TM, 2) * 1.3), 32 * 1024 * 1024)))

    # ---- Pad parameters once (zero padding is mathematically inert). ----
    w1_p = jnp.pad(w1_eff, ((0, D_pad - D), (0, H_pad - H))).astype(compute_dtype)
    w2_p = jnp.pad(jnp.asarray(w2, jnp.float32),
                   ((0, H_pad - H), (0, D_pad - D))).astype(compute_dtype)
    b1_p = jnp.pad(b1_eff, (0, H_pad - H)).reshape(1, H_pad)
    b2_p = jnp.pad(b2_f, (0, D_pad - D)).reshape(1, D_pad)

    # ---- Activations: skip the HBM pad/slice passes when already aligned. ----
    x2 = x.reshape(N, D)
    fast_path = (D == D_pad) and (N % _SUBLANE == 0)
    if fast_path:
        rows = N
        grid_rows = _cdiv(N, TM)      # ragged last row tile -> Pallas masks the stores
    else:
        rows = _round_up(N, TM)
        x2 = jnp.pad(x2, ((0, rows - N), (0, D_pad - D)))
        grid_rows = rows // TM
    grid = (grid_rows, KT)

    cost = pl.CostEstimate(
        flops=4 * N * D * H,                                          # two matmuls
        transcendentals=N * H,                                        # erf / tanh in GELU
        bytes_accessed=(N * D * (x_isize + o_isize)
                        + 2 * D * H * wt_isize + (D + H) * 4),
    )

    def _build(use_single_buffer):
        def _spec(shape, index_map, single):
            if single and use_single_buffer:
                return pl.BlockSpec(shape, index_map, pipeline_mode=pl.Buffered(1))
            return pl.BlockSpec(shape, index_map)

        const_w = (KT == 1)           # weights grid-invariant only when not H-streamed
        in_specs = [
            pl.BlockSpec((TM, D_pad), lambda i, k: (i, 0)),           # x tile (pipelined)
            _spec((D_pad, TH), lambda i, k: (0, k), const_w),          # w1 (gamma folded)
            _spec((1, TH), lambda i, k: (0, k), const_w),              # b1 (beta folded)
            _spec((TH, D_pad), lambda i, k: (k, 0), const_w),          # w2
            _spec((1, D_pad), lambda i, k: (0, 0), True),              # b2 (always const)
        ]
        out_specs = pl.BlockSpec((TM, D_pad), lambda i, k: (i, 0))

        if KT == 1:
            kern = _make_single_pass_kernel(D, D_pad, compute_dtype, gelu_mode)
            scratch = ()
        else:
            kern = _make_h_tiled_kernel(D, D_pad, compute_dtype, gelu_mode)
            scratch = (pltpu.VMEM((TM, D_pad), jnp.float32),           # acc
                       pltpu.VMEM((TM, D_pad), compute_dtype))         # cached LN(x)

        return pl.pallas_call(
            kern,
            out_shape=jax.ShapeDtypeStruct((rows, D_pad), out_dtype),
            grid=grid,
            in_specs=in_specs,
            out_specs=out_specs,
            scratch_shapes=scratch,
            compiler_params=pltpu.CompilerParams(
                dimension_semantics=("parallel", "arbitrary"),
                vmem_limit_bytes=vmem_limit,
            ),
            cost_estimate=cost,
        )

    try:
        out2 = _build(True)(x2, w1_p, b1_p, w2_p, b2_p)
    except Exception:
        # Fall back to default double-buffered pipelining if Buffered(1) is rejected.
        out2 = _build(False)(x2, w1_p, b1_p, w2_p, b2_p)

    if fast_path:
        return out2.reshape(B, S, D)
    return out2[:N, :D].reshape(B, S, D)


def feedforward_ref(x, gamma, beta, w1, b1, w2, b2):
    """Pure-JAX f32 reference matching the PyTorch module semantics."""
    xf = x.astype(jnp.float32)
    mean = jnp.mean(xf, axis=-1, keepdims=True)
    var = jnp.mean((xf - mean) ** 2, axis=-1, keepdims=True)
    xn = (xf - mean) * lax.rsqrt(var + 1e-5) * gamma.reshape(-1) + beta.reshape(-1)
    h = jnp.dot(xn, w1, precision=lax.Precision.HIGHEST) + b1.reshape(-1)
    h = jax.nn.gelu(h, approximate=False)
    y = jnp.dot(h, w2, precision=lax.Precision.HIGHEST) + b2.reshape(-1)
    return (y + xf).astype(x.dtype)


if __name__ == "__main__":
    # ---- Test 1: module-like small shapes (D=32 not lane-aligned -> padded path). ----
    B, S, D, H = 2, 8, 32, 64
    k1, k2, k3, k4, k5, k6, k7 = jax.random.split(jax.random.PRNGKey(0), 7)
    x = jax.random.normal(k1, (B, S, D), dtype=jnp.float32)
    gamma = 1.0 + 0.1 * jax.random.normal(k2, (D,), dtype=jnp.float32)
    beta = 0.05 * jax.random.normal(k3, (D,), dtype=jnp.float32)
    w1 = jax.random.normal(k4, (D, H), dtype=jnp.float32) * (1.0 / D ** 0.5)
    b1 = 0.02 * jax.random.normal(k5, (H,), dtype=jnp.float32)
    w2 = jax.random.normal(k6, (H, D), dtype=jnp.float32) * (1.0 / H ** 0.5)
    b2 = 0.02 * jax.random.normal(k7, (D,), dtype=jnp.float32)

    ref = feedforward_ref(x, gamma, beta, w1, b1, w2, b2)

    # f32 compute path (tolerance covers MXU default-precision f32 matmul passes).
    out_f32 = jax.block_until_ready(
        feedforward_pallas(x, gamma, beta, w1, b1, w2, b2, compute_dtype=jnp.float32))
    assert out_f32.shape == (B, S, D)
    assert jnp.allclose(out_f32, ref, atol=2e-2, rtol=2e-2), "f32 path mismatch vs reference"

    # bf16 MXU path (default / fast).
    out_bf16 = jax.block_until_ready(
        feedforward_pallas(x, gamma, beta, w1, b1, w2, b2, compute_dtype=jnp.bfloat16))
    assert out_bf16.shape == (B, S, D)
    assert jnp.allclose(out_bf16, ref, atol=5e-2, rtol=5e-2), "bf16 path mismatch vs reference"

    # ---- Test 2: lane-aligned D (no wrapper pad/slice) + streamed hidden tiles (KT=2). ----
    B2, S2, D2, H2 = 2, 12, 128, 512
    q1, q2, q3, q4, q5, q6, q7 = jax.random.split(jax.random.PRNGKey(1), 7)
    xb = jax.random.normal(q1, (B2, S2, D2), dtype=jnp.float32)
    gb = 1.0 + 0.1 * jax.random.normal(q2, (D2,), dtype=jnp.float32)
    bb = 0.05 * jax.random.normal(q3, (D2,), dtype=jnp.float32)
    w1b = jax.random.normal(q4, (D2, H2), dtype=jnp.float32) * (1.0 / D2 ** 0.5)
    b1b = 0.02 * jax.random.normal(q5, (H2,), dtype=jnp.float32)
    w2b = jax.random.normal(q6, (H2, D2), dtype=jnp.float32) * (1.0 / H2 ** 0.5)
    b2b = 0.02 * jax.random.normal(q7, (D2,), dtype=jnp.float32)

    refb = feedforward_ref(xb, gb, bb, w1b, b1b, w2b, b2b)
    outb = jax.block_until_ready(
        feedforward_pallas(xb, gb, bb, w1b, b1b, w2b, b2b,
                           compute_dtype=jnp.float32, hidden_block=256))
    assert outb.shape == (B2, S2, D2)
    assert jnp.allclose(outb, refb, atol=2e-2, rtol=2e-2), "H-tiled path mismatch vs reference"

    print("KERNEL_OK")
</pallas_src>

<mosaic_0001>
module attributes {stable_mosaic.version = 11 : i64} {
  func.func @kernel(%arg0: i32, %arg1: i32, %arg2: memref<8x128xf32, #tpu.memory_space<vmem>>, %arg3: memref<128x128xf32, #tpu.memory_space<vmem>>, %arg4: memref<1x128xf32, #tpu.memory_space<vmem>>, %arg5: memref<128x128xf32, #tpu.memory_space<vmem>>, %arg6: memref<1x128xf32, #tpu.memory_space<vmem>>, %arg7: memref<8x128xf32, #tpu.memory_space<vmem>>) attributes {dimension_semantics = [#tpu.dimension_semantics<parallel>, #tpu.dimension_semantics<arbitrary>], iteration_bounds = array<i64: 2, 1>, scalar_prefetch = 0 : i64, scratch_operands = 0 : i64, tpu.core_type = #tpu.core_type<tc>, window_params = [{transform_indices = @transform_0, window_bounds = array<i64: 8, 128>}, {pipeline_mode = #tpu.pipeline_mode<synchronous>, transform_indices = @transform_1, window_bounds = array<i64: 128, 128>}, {pipeline_mode = #tpu.pipeline_mode<synchronous>, transform_indices = @transform_2, window_bounds = array<i64: 1, 128>}, {pipeline_mode = #tpu.pipeline_mode<synchronous>, transform_indices = @transform_3, window_bounds = array<i64: 128, 128>}, {pipeline_mode = #tpu.pipeline_mode<synchronous>, transform_indices = @transform_4, window_bounds = array<i64: 1, 128>}, {transform_indices = @transform_5, window_bounds = array<i64: 8, 128>}]} {
    %c0 = arith.constant 0 : index
    %c0_0 = arith.constant 0 : index
    %0 = vector.load %arg2[%c0, %c0_0] : memref<8x128xf32, #tpu.memory_space<vmem>>, vector<8x128xf32>
    %cst = arith.constant dense<0.000000e+00> : vector<8xf32>
    %1 = vector.multi_reduction <add>, %0, %cst [1] : vector<8x128xf32> to vector<8xf32>
    %2 = vector.shape_cast %1 : vector<8xf32> to vector<8x1xf32>
    %cst_1 = arith.constant 3.125000e-02 : f32
    %3 = vector.broadcast %cst_1 : f32 to vector<8x1xf32>
    %4 = arith.mulf %2, %3 : vector<8x1xf32>
    %5 = vector.broadcast %4 : vector<8x1xf32> to vector<8x128xf32>
    %6 = arith.subf %0, %5 : vector<8x128xf32>
    %7 = tpu.iota {dimensions = array<i32: 1>} : vector<8x128xi32>
    %c32_i32 = arith.constant 32 : i32
    %8 = vector.broadcast %c32_i32 : i32 to vector<8x128xi32>
    %9 = arith.cmpi slt, %7, %8 : vector<8x128xi32>
    %cst_2 = arith.constant 0.000000e+00 : f32
    %10 = vector.broadcast %cst_2 : f32 to vector<8x128xf32>
    %11 = arith.select %9, %6, %10 : vector<8x128xi1>, vector<8x128xf32>
    %12 = arith.mulf %11, %11 : vector<8x128xf32>
    %cst_3 = arith.constant dense<0.000000e+00> : vector<8xf32>
    %13 = vector.multi_reduction <add>, %12, %cst_3 [1] : vector<8x128xf32> to vector<8xf32>
    %14 = vector.shape_cast %13 : vector<8xf32> to vector<8x1xf32>
    %cst_4 = arith.constant 3.125000e-02 : f32
    %15 = vector.broadcast %cst_4 : f32 to vector<8x1xf32>
    %16 = arith.mulf %14, %15 : vector<8x1xf32>
    %cst_5 = arith.constant 9.99999974E-6 : f32
    %17 = vector.broadcast %cst_5 : f32 to vector<8x1xf32>
    %18 = arith.addf %16, %17 : vector<8x1xf32>
    %19 = math.rsqrt %18 : vector<8x1xf32>
    %20 = vector.broadcast %19 : vector<8x1xf32> to vector<8x128xf32>
    %21 = arith.mulf %11, %20 : vector<8x128xf32>
    %c0_6 = arith.constant 0 : index
    %c0_7 = arith.constant 0 : index
    %22 = vector.load %arg3[%c0_6, %c0_7] : memref<128x128xf32, #tpu.memory_space<vmem>>, vector<128x128xf32>
    %cst_8 = arith.constant dense<0.000000e+00> : vector<8x128xf32>
    %23 = tpu.matmul %21, %22, %cst_8 {dimension_numbers = #tpu.dot_dimension_numbers<[1], [0], [0], [1], [0, 0, 1, 1], [], []>} : vector<8x128xf32>, vector<128x128xf32>, vector<8x128xf32> -> vector<8x128xf32>
    %c0_9 = arith.constant 0 : index
    %c0_10 = arith.constant 0 : index
    %24 = vector.load %arg4[%c0_9, %c0_10] : memref<1x128xf32, #tpu.memory_space<vmem>>, vector<1x128xf32>
    %25 = vector.broadcast %24 : vector<1x128xf32> to vector<8x128xf32>
    %26 = arith.addf %23, %25 : vector<8x128xf32>
    %cst_11 = arith.constant 5.000000e-01 : f32
    %27 = vector.broadcast %cst_11 : f32 to vector<8x128xf32>
    %28 = arith.mulf %27, %26 : vector<8x128xf32>
    %cst_12 = arith.constant 0.707106769 : f32
    %29 = vector.broadcast %cst_12 : f32 to vector<8x128xf32>
    %30 = arith.mulf %26, %29 : vector<8x128xf32>
    %31 = math.erf %30 : vector<8x128xf32>
    %cst_13 = arith.constant 1.000000e+00 : f32
    %32 = vector.broadcast %cst_13 : f32 to vector<8x128xf32>
    %33 = arith.addf %32, %31 : vector<8x128xf32>
    %34 = arith.mulf %28, %33 : vector<8x128xf32>
    %c0_14 = arith.constant 0 : index
    %c0_15 = arith.constant 0 : index
    %35 = vector.load %arg5[%c0_14, %c0_15] : memref<128x128xf32, #tpu.memory_space<vmem>>, vector<128x128xf32>
    %cst_16 = arith.constant dense<0.000000e+00> : vector<8x128xf32>
    %36 = tpu.matmul %34, %35, %cst_16 {dimension_numbers = #tpu.dot_dimension_numbers<[1], [0], [0], [1], [0, 0, 1, 1], [], []>} : vector<8x128xf32>, vector<128x128xf32>, vector<8x128xf32> -> vector<8x128xf32>
    %c0_17 = arith.constant 0 : index
    %c0_18 = arith.constant 0 : index
    %37 = vector.load %arg6[%c0_17, %c0_18] : memref<1x128xf32, #tpu.memory_space<vmem>>, vector<1x128xf32>
    %38 = vector.broadcast %37 : vector<1x128xf32> to vector<8x128xf32>
    %39 = arith.addf %36, %38 : vector<8x128xf32>
    %40 = arith.addf %39, %0 : vector<8x128xf32>
    %c0_19 = arith.constant 0 : index
    %c0_20 = arith.constant 0 : index
    %41 = vector.load %arg7[%c0_19, %c0_20] : memref<8x128xf32, #tpu.memory_space<vmem>>, vector<8x128xf32>
    tpu.vector_store %arg7[%c0_19, %c0_20], %40 {strides = array<i32>} : memref<8x128xf32, #tpu.memory_space<vmem>>, vector<8x128xf32>,
    return
  }
  func.func @transform_0(%arg0: i32, %arg1: i32) -> (i32, i32) {
    %c0_i32 = arith.constant 0 : i32
    %c0_i32_0 = arith.constant 0 : i32
    return %arg0, %c0_i32 : i32, i32
  }
  func.func @transform_1(%arg0: i32, %arg1: i32) -> (i32, i32) {
    %c0_i32 = arith.constant 0 : i32
    %c0_i32_0 = arith.constant 0 : i32
    return %c0_i32, %arg1 : i32, i32
  }
  func.func @transform_2(%arg0: i32, %arg1: i32) -> (i32, i32) {
    %c0_i32 = arith.constant 0 : i32
    %c0_i32_0 = arith.constant 0 : i32
    return %c0_i32, %arg1 : i32, i32
  }
  func.func @transform_3(%arg0: i32, %arg1: i32) -> (i32, i32) {
    %c0_i32 = arith.constant 0 : i32
    %c0_i32_0 = arith.constant 0 : i32
    return %arg1, %c0_i32 : i32, i32
  }
  func.func @transform_4(%arg0: i32, %arg1: i32) -> (i32, i32) {
    %c0_i32 = arith.constant 0 : i32
    %c0_i32_0 = arith.constant 0 : i32
    %c0_i32_1 = arith.constant 0 : i32
    return %c0_i32, %c0_i32_0 : i32, i32
  }
  func.func @transform_5(%arg0: i32, %arg1: i32) -> (i32, i32) {
    %c0_i32 = arith.constant 0 : i32
    %c0_i32_0 = arith.constant 0 : i32
    return %arg0, %c0_i32 : i32, i32
  }
}

module attributes {stable_mosaic.version = 11 : i64} {
  func.func @kernel(%arg0: i32, %arg1: i32, %arg2: memref<8x128xf32, #tpu.memory_space<vmem>>, %arg3: memref<128x128xf32, #tpu.memory_space<vmem>>, %arg4: memref<1x128xf32, #tpu.memory_space<vmem>>, %arg5: memref<128x128xf32, #tpu.memory_space<vmem>>, %arg6: memref<1x128xf32, #tpu.memory_space<vmem>>, %arg7: memref<8x128xf32, #tpu.memory_space<vmem>>) attributes {dimension_semantics = [#tpu.dimension_semantics<parallel>, #tpu.dimension_semantics<arbitrary>], iteration_bounds = array<i64: 2, 1>, scalar_prefetch = 0 : i64, scratch_operands = 0 : i64, tpu.core_type = #tpu.core_type<tc>, window_params = [{transform_indices = @transform_0, window_bounds = array<i64: 8, 128>}, {transform_indices = @transform_1, window_bounds = array<i64: 128, 128>}, {transform_indices = @transform_2, window_bounds = array<i64: 1, 128>}, {transform_indices = @transform_3, window_bounds = array<i64: 128, 128>}, {pipeline_mode = #tpu.pipeline_mode<synchronous>, transform_indices = @transform_4, window_bounds = array<i64: 1, 128>}, {transform_indices = @transform_5, window_bounds = array<i64: 8, 128>}]} {
    %c0 = arith.constant 0 : index
    %c0_0 = arith.constant 0 : index
    %0 = vector.load %arg2[%c0, %c0_0] : memref<8x128xf32, #tpu.memory_space<vmem>>, vector<8x128xf32>
    %cst = arith.constant dense<0.000000e+00> : vector<8xf32>
    %1 = vector.multi_reduction <add>, %0, %cst [1] : vector<8x128xf32> to vector<8xf32>
    %2 = vector.shape_cast %1 : vector<8xf32> to vector<8x1xf32>
    %cst_1 = arith.constant 3.125000e-02 : f32
    %3 = vector.broadcast %cst_1 : f32 to vector<8x1xf32>
    %4 = arith.mulf %2, %3 : vector<8x1xf32>
    %5 = vector.broadcast %4 : vector<8x1xf32> to vector<8x128xf32>
    %6 = arith.subf %0, %5 : vector<8x128xf32>
    %7 = tpu.iota {dimensions = array<i32: 1>} : vector<8x128xi32>
    %c32_i32 = arith.constant 32 : i32
    %8 = vector.broadcast %c32_i32 : i32 to vector<8x128xi32>
    %9 = arith.cmpi slt, %7, %8 : vector<8x128xi32>
    %cst_2 = arith.constant 0.000000e+00 : f32
    %10 = vector.broadcast %cst_2 : f32 to vector<8x128xf32>
    %11 = arith.select %9, %6, %10 : vector<8x128xi1>, vector<8x128xf32>
    %12 = arith.mulf %11, %11 : vector<8x128xf32>
    %cst_3 = arith.constant dense<0.000000e+00> : vector<8xf32>
    %13 = vector.multi_reduction <add>, %12, %cst_3 [1] : vector<8x128xf32> to vector<8xf32>
    %14 = vector.shape_cast %13 : vector<8xf32> to vector<8x1xf32>
    %cst_4 = arith.constant 3.125000e-02 : f32
    %15 = vector.broadcast %cst_4 : f32 to vector<8x1xf32>
    %16 = arith.mulf %14, %15 : vector<8x1xf32>
    %cst_5 = arith.constant 9.99999974E-6 : f32
    %17 = vector.broadcast %cst_5 : f32 to vector<8x1xf32>
    %18 = arith.addf %16, %17 : vector<8x1xf32>
    %19 = math.rsqrt %18 : vector<8x1xf32>
    %20 = vector.broadcast %19 : vector<8x1xf32> to vector<8x128xf32>
    %21 = arith.mulf %11, %20 : vector<8x128xf32>
    %c0_6 = arith.constant 0 : index
    %c0_7 = arith.constant 0 : index
    %22 = vector.load %arg3[%c0_6, %c0_7] : memref<128x128xf32, #tpu.memory_space<vmem>>, vector<128x128xf32>
    %cst_8 = arith.constant dense<0.000000e+00> : vector<8x128xf32>
    %23 = tpu.matmul %21, %22, %cst_8 {dimension_numbers = #tpu.dot_dimension_numbers<[1], [0], [0], [1], [0, 0, 1, 1], [], []>} : vector<8x128xf32>, vector<128x128xf32>, vector<8x128xf32> -> vector<8x128xf32>
    %c0_9 = arith.constant 0 : index
    %c0_10 = arith.constant 0 : index
    %24 = vector.load %arg4[%c0_9, %c0_10] : memref<1x128xf32, #tpu.memory_space<vmem>>, vector<1x128xf32>
    %25 = vector.broadcast %24 : vector<1x128xf32> to vector<8x128xf32>
    %26 = arith.addf %23, %25 : vector<8x128xf32>
    %cst_11 = arith.constant 5.000000e-01 : f32
    %27 = vector.broadcast %cst_11 : f32 to vector<8x128xf32>
    %28 = arith.mulf %27, %26 : vector<8x128xf32>
    %cst_12 = arith.constant 0.707106769 : f32
    %29 = vector.broadcast %cst_12 : f32 to vector<8x128xf32>
    %30 = arith.mulf %26, %29 : vector<8x128xf32>
    %31 = math.erf %30 : vector<8x128xf32>
    %cst_13 = arith.constant 1.000000e+00 : f32
    %32 = vector.broadcast %cst_13 : f32 to vector<8x128xf32>
    %33 = arith.addf %32, %31 : vector<8x128xf32>
    %34 = arith.mulf %28, %33 : vector<8x128xf32>
    %c0_14 = arith.constant 0 : index
    %c0_15 = arith.constant 0 : index
    %35 = vector.load %arg5[%c0_14, %c0_15] : memref<128x128xf32, #tpu.memory_space<vmem>>, vector<128x128xf32>
    %cst_16 = arith.constant dense<0.000000e+00> : vector<8x128xf32>
    %36 = tpu.matmul %34, %35, %cst_16 {dimension_numbers = #tpu.dot_dimension_numbers<[1], [0], [0], [1], [0, 0, 1, 1], [], []>} : vector<8x128xf32>, vector<128x128xf32>, vector<8x128xf32> -> vector<8x128xf32>
    %c0_17 = arith.constant 0 : index
    %c0_18 = arith.constant 0 : index
    %37 = vector.load %arg6[%c0_17, %c0_18] : memref<1x128xf32, #tpu.memory_space<vmem>>, vector<1x128xf32>
    %38 = vector.broadcast %37 : vector<1x128xf32> to vector<8x128xf32>
    %39 = arith.addf %36, %38 : vector<8x128xf32>
    %40 = arith.addf %39, %0 : vector<8x128xf32>
    %c0_19 = arith.constant 0 : index
    %c0_20 = arith.constant 0 : index
    %41 = vector.load %arg7[%c0_19, %c0_20] : memref<8x128xf32, #tpu.memory_space<vmem>>, vector<8x128xf32>
    tpu.vector_store %arg7[%c0_19, %c0_20], %40 {strides = array<i32>} : memref<8x128xf32, #tpu.memory_space<vmem>>, vector<8x128xf32>,
    return
  }
  func.func @transform_0(%arg0: i32, %arg1: i32) -> (i32, i32) {
    %c0_i32 = arith.constant 0 : i32
    %c0_i32_0 = arith.constant 0 : i32
    return %arg0, %c0_i32 : i32, i32
  }
  func.func @transform_1(%arg0: i32, %arg1: i32) -> (i32, i32) {
    %c0_i32 = arith.constant 0 : i32
    %c0_i32_0 = arith.constant 0 : i32
    return %c0_i32, %arg1 : i32, i32
  }
  func.func @transform_2(%arg0: i32, %arg1: i32) -> (i32, i32) {
    %c0_i32 = arith.constant 0 : i32
    %c0_i32_0 = arith.constant 0 : i32
    return %c0_i32, %arg1 : i32, i32
  }
  func.func @transform_3(%arg0: i32, %arg1: i32) -> (i32, i32) {
    %c0_i32 = arith.constant 0 : i32
    %c0_i32_0 = arith.constant 0 : i32
    return %arg1, %c0_i32 : i32, i32
  }
  func.func @transform_4(%arg0: i32, %arg1: i32) -> (i32, i32) {
    %c0_i32 = arith.constant 0 : i32
    %c0_i32_0 = arith.constant 0 : i32
    %c0_i32_1 = arith.constant 0 : i32
    return %c0_i32, %c0_i32_0 : i32, i32
  }
  func.func @transform_5(%arg0: i32, %arg1: i32) -> (i32, i32) {
    %c0_i32 = arith.constant 0 : i32
    %c0_i32_0 = arith.constant 0 : i32
    return %arg0, %c0_i32 : i32, i32
  }
}

</mosaic_0001>

<bundles_post_ra>
// kernel: tpu_custom_call.1
= control target key start
LH: loop header
LB: loop body
LE: loop exit
PB: predicated region body
PF: predicated region fallthrough
CT: control target
= control target key end

     0   :  { %s1289_s0 = inlined_call_operand.hbm [shape: f32[16,128], index: 0, kind: input, shape index: {}]   ;;  %s1290_s1 = inlined_call_operand.hbm [shape: f32[128,128], index: 1, kind: input, shape index: {}]   ;;  %s1291_s2 = inlined_call_operand.vmem [shape: f32[1,128], index: 2, kind: input, shape index: {}]   ;;  %s1292_s3 = inlined_call_operand.hbm [shape: f32[128,128], index: 3, kind: input, shape index: {}]   ;;  %s1293_s4 = inlined_call_operand.vmem [shape: f32[1,128], index: 4, kind: input, shape index: {}]   ;;  %s1294_s5 = inlined_call_operand.hbm [shape: f32[16,128], index: 5, kind: output, shape index: {}]  }
   0x1   :  { %1298 = sst [smem:[#allocation12_spill]] %s1290_s1 }
   0x2   :  { %10 = vsyncpa [#allocation3], 0 }
   0x3   :  { %12 = vsyncpa [#allocation3 + $0x1], 0 }
   0x4   :  { %13 = vsyncpa [#allocation6], 0 }
   0x5   :  { %14 = vsyncpa [#allocation4], 0 }
   0x6   :  { %16 = vsyncpa [#allocation4 + $0x1], 0  ;;  %s1066_s18 = smov 0   ;;  %s1068_s19 = smov 0  }
   0x7   :  { %s1070_s20 = smov 0   ;;  %s1072_s21 = smov 0  }
   0x8   :  { %s1074_s22 = smov 0   ;;  %s1076_s23 = smov 0  }
   0x9 LB: > { %s647_s24 = sadd.s32 4294967295, %s1026_s23   ;;  %s648_s25 = sadd.s32 4294967294, %s1026_s23   ;;  %s1026_s23 = sphi %s1076_s23, %s22_s23   ;;  %s1022_s22 = sphi %s1074_s22, %s1316_s22   ;;  %s1018_s21 = sphi %s1072_s21, %s1315_s21   ;;  %s1014_s20 = sphi %s1070_s20, %s1314_s20   ;;  %s1010_s19 = sphi %s1068_s19, %s1313_s19   ;;  %s1006_s18 = sphi %s1066_s18, %s1312_s18  }
   0xa   : > { %p54_p0 = scmp.ne.s32.totalorder %s1010_s19, %s1006_s18  ;;  %p1100_p1 = scmp.eq.s32.totalorder %s647_s24, 0 }
   0xb   : > { %p1104_p2 = scmp.eq.s32.totalorder %s647_s24, 1  ;;  %p183_p3 = scmp.eq.s32.totalorder %s648_s25, 1 }
   0xc   : > { %s1299_s26 = scalar_select %p1100_p1, 1, 0 }
   0xd   : > { %p1110_p4 = por %p1100_p1, %p54_p0  ;;  %p649_p5 = scmp.ge.s32.totalorder %s1026_s23, 1 }
   0xe   : > { %p1115_p6 = por %p183_p3, %p54_p0  ;;  %p190_p7 = scmp.lt.s32.totalorder %s1026_s23, 3 }
   0xf   : > { %s1301_s28 = scalar_select %p1110_p4, 1, 0 }
  0x10   : > { %s1302_s29 = scalar_select %p1115_p6, 1, 0 }
  0x11   : > { %p1120_p8 = pnand %p649_p5, %p190_p7  ;;  %s1028_s6 = smov [#allocation5]  }
  0x12   : > { %s204_s7 = sshll.u32 %s1028_s6, 4  ;;  %s1029_s9 = smov [#allocation7]   ;;  %s205_s7 = int_to_ptr.vmem [resolvable:$true] %s204_s7 }
  0x13   : > { %p783_p9 = pneg %p1120_p8  ;;  %s226_s10 = sshll.u32 %s1029_s9, 4  ;;  %s227_s10 = int_to_ptr.vmem [resolvable:$true] %s226_s10 }
  0x14   : > { %s873_s11 = scalar_lea.vmem %s205_s7, 2048  ;;  %p881_p5 = scmp.lt.s32.totalorder %s205_s7, %s205_s7 }
  0x15   : > { %p1129_p11 = pnand %p783_p9, %p1100_p1  ;;  %p874_p13 = scmp.ne.s32.totalorder %s205_s7, %s873_s11 }
  0x16   : > { %p882_p7 = scmp.lt.s32.totalorder %s873_s11, %s873_s11 }
  0x17   : > { %p864_p12 = pneg %p1129_p11 }
  0x18   : > { %p883_p10 = por %p882_p7, %p881_p5 }
  0x19   : > { %p876_p0 = pnand %p874_p13, %p864_p12 }
  0x1b   : > { %p877_p3 = pneg %p876_p0 }
  0x1d   : > { %p884_p9 = pnand %p883_p10, %p877_p3 }
  0x1f   : > { %887 = shalt.err (!%p884_p9)
}
  0x20   : > { %s1030_s12 = smov 128   ;;  %s1031_s13 = smov 8  }
  0x21   : > { %s1305_s1 = sld [smem:[#allocation12_spill]]  ;;  %s899_s16 = scalar_lea.vmem %s227_s10, 2048 }
  0x22   : > { %p900_p6 = scmp.ne.s32.totalorder %s227_s10, %s899_s16  ;;  %p907_p1 = scmp.lt.s32.totalorder %s227_s10, %s227_s10 }
  0x23   : > { %p908_p4 = scmp.lt.s32.totalorder %s899_s16, %s899_s16 }
  0x24   : > { %p902_p13 = pnand %p900_p6, %p864_p12 }
  0x25   : > { %p909_p5 = por %p908_p4, %p907_p1 }
  0x26   : > { %p903_p0 = pneg %p902_p13 }
  0x27   : > { %786 = dma.hbm_to_vmem [thread:$0]  (!%p1129_p11), %s1305_s1, 2048, %s205_s7, [#allocation6], %s1030_s12, %s1030_s12, %s1031_s13  }
  0x28   : > { %p910_p10 = pnand %p909_p5, %p903_p0 }
  0x2a   : > { %913 = shalt.err (!%p910_p10)
}
  0x2b   : > { %789 = dma.hbm_to_vmem [thread:$0]  (!%p1129_p11), %s1292_s3, 2048, %s227_s10, [#allocation6], %s1030_s12, %s1030_s12, %s1031_s13  }
  0x2c   : > { %s34_s25 = sadd.s32 1, %s1022_s22  ;;  %s41_s6 = sadd.s32 1, %s1014_s20 }
  0x2d   : > { %p36_p1 = scmp.ge.s32.totalorder %s34_s25, 2  ;;  %p48_p4 = scmp.ne.s32.totalorder %s1014_s20, %s1010_s19 }
  0x2e   : > { %p49_p6 = scmp.eq.s32.totalorder %s1026_s23, 0  ;;  %p800_p12 = scmp.lt.s32.totalorder %s1026_s23, 2 }
  0x2f   : > { %s1318_s25 = smov (%p36_p1, %s34_s25), 0  ;;  %p1161_p7 = por %p1104_p2, %p48_p4 }
  0x30   : > { %p50_p3 = por %p49_p6, %p48_p4  ;;  %s38_s8 = ssub.s32 %s1022_s22, %s1318_s25 }
  0x31   : > { %s243_s9 = sand.u32 1, %s1014_s20   ;;  %p39_p9 = scmp.eq.s32.totalorder %s38_s8, 0 }
  0x32   : > { %s654_s10 = sshll.u32 %s243_s9, 3  ;;  %s655_s11 = sshll.u32 %s1022_s22, 7 }
  0x33   : > { %s1170_s12 = scalar_select %p39_p9, %s1014_s20, %s41_s6  }
  0x34   : > { %s252_s15 = scalar_lea.hbm %s1289_s0, %s655_s11  ;;  %s247_s16 = scalar_lea.vmem [#allocation2], %s654_s10 }
  0x35   : > { %s254_s17 = sshll.u32 %s247_s16, 4  ;;  %p1177_p11 = pnand %p800_p12, %p50_p3  ;;  %s255_s17 = int_to_ptr.vmem [resolvable:$true] %s254_s17 }
  0x36   : > { %s244_s24 = scalar_lea.sflag [#allocation3], %s243_s9  ;;  %s927_s8 = scalar_lea.vmem %s255_s17, 128 }
  0x37   : > { %p916_p2 = pneg %p1177_p11  ;;  %p928_p13 = scmp.ne.s32.totalorder %s255_s17, %s927_s8 }
  0x38   : > { %s1032_s6 = smov [#allocation2]  }
  0x39   : > { %p930_p0 = pnand %p928_p13, %p916_p2  ;;  %s932_s1 = sshll.u32 %s1032_s6, 4  ;;  %s933_s1 = int_to_ptr.vmem [resolvable:$false] %s932_s1 }
  0x3a   : > { %s934_s11 = scalar_lea.vmem %s933_s1, 256  ;;  %p935_p10 = scmp.lt.s32.totalorder %s255_s17, %s933_s1 }
  0x3b   : > { %p931_p5 = pneg %p930_p0  ;;  %p936_p1 = scmp.lt.s32.totalorder %s934_s11, %s927_s8 }
  0x3d   : > { %p937_p4 = por %p936_p1, %p935_p10 }
  0x3f   : > { %p938_p6 = pnand %p937_p4, %p931_p5 }
  0x41   : > { %941 = shalt.err (!%p938_p6)
}
  0x42   : > { %793 = dma.hbm_to_vmem [thread:$0]  (!%p1177_p11), %s252_s15, 128, %s255_s17, %s244_s24  }
  0x43   : > { %263 = sbr.rel (%p1120_p8) target bundleno = 805 (0x325), region = 40  ;;  %s1188_s9 = sand.u32 (!%p1120_p8), 1, %s1010_s19  }
  0x44   : > { %s657_s10 = sshll.u32 (!%p1120_p8), %s1188_s9, 3  ;;  %s266_s13 = scalar_lea.sflag (!%p1120_p8), [#allocation3], %s1188_s9 }
  0x45   : > { %s269_s1 = scalar_lea.vmem (!%p1120_p8), [#allocation2], %s657_s10  ;;  %p1308_p12 = scmp.ne.s32.totalorder (!%p1120_p8), %s1301_s28, 0 }
  0x48   : > { %993 = dma.done.wait (%p1308_p12), %s266_s13, 128  }
  0x49   : > { %995 = vsyncadd (%p1308_p12), %s266_s13, 4294967168  ;;  %p1309_p3 = scmp.ne.s32.totalorder %s1299_s26, 0 }
  0x4b   : > { %997 = dma.done.wait (%p1309_p3), [#allocation6], 4096  }
  0x4c   : > { %999 = vsyncadd (%p1309_p3), [#allocation6], 4294963200  ;;  %v1202_v0 = vld [vmem:[%s269_s1] sm:$0xff]  ;;  %v1033_v2 = vmov 0.0   ;;  %v340_v4 = vld [vmem:[#allocation5 + $0x68] sm:$0xff]  ;;  %v316_v8 = vlaneseq  ;;  %vm1034_vm1 = vmmov 0  }
  0x4d   : > { %312 = vadd.xlane.f32.xlu0 %v1202_v0  ;;  %v342_v1 = vld [vmem:[#allocation5 + $0x78] sm:$0xff]  ;;  %701 = vmatprep.subr.mxu0 %v1033_v2  ;;  %v341_v3 = vld [vmem:[#allocation5 + $0x70] sm:$0xff]  ;;  %v339_v5 = vld [vmem:[#allocation5 + $0x60] sm:$0xff]  ;;  %s664_s15 = sshll.u32 %s1018_s21, 7  ;;  %s306_s16 = scalar_lea.vmem [#allocation8], %s657_s10 }
  0x4e   : > { %736 = vmatprep.subr.mxu1 %v1033_v2  ;;  %702 = vmatpush3.msra.mxu0 %v342_v1  ;;  %v338_v6 = vld [vmem:[#allocation5 + $0x58] sm:$0xff]  ;;  %v337_v7 = vld [vmem:[#allocation5 + $0x50] sm:$0xff]  ;;  %v317_v9 = vand.u32 127, %v316_v8  ;;  %v336_v15 = vld [vmem:[#allocation5 + $0x48] sm:$0xff]  ;;  %s534_s17 = sshll.u32 %s306_s16, 4  ;;  %s532_s8 = scalar_lea.hbm %s1294_s5, %s664_s15  ;;  %s535_s17 = int_to_ptr.vmem [resolvable:$true] %s534_s17 }
  0x4f   : > { %703 = vmatprep.subr.mxu0 %v1033_v2  ;;  %v335_v16 = vld [vmem:[#allocation5 + $0x40] sm:$0xff]  ;;  %v334_v17 = vld [vmem:[#allocation5 + $0x38] sm:$0xff]  ;;  %v333_v18 = vld [vmem:[#allocation5 + $0x30] sm:$0xff]  ;;  %733 = vmatprep.mubr.msk.f32.mxu0 %vm1034_vm1, %v1033_v2  ;;  %s521_s6 = scalar_lea.sflag [#allocation4], %s1188_s9  ;;  %s942_s11 = scalar_lea.vmem %s535_s17, 128 }
  0x50   : > { %704 = vmatpush3.msra.mxu0 %v341_v3  ;;  %vm318_vm0 = vcmp.lt.s32.totalorder %v317_v9, 32  ;;  %v332_v19 = vld [vmem:[#allocation5 + $0x28] sm:$0xff]  ;;  %768 = vmatprep.mubr.msk.f32.mxu1 %vm1034_vm1, %v1033_v2  ;;  %v331_v20 = vld [vmem:[#allocation5 + $0x20] sm:$0xff]  ;;  %v330_v21 = vld [vmem:[#allocation5 + $0x18] sm:$0xff]  ;;  %p943_p8 = scmp.ne.s32.totalorder %s535_s17, %s942_s11  ;;  %s1035_s21 = smov [#allocation8]  }
  0x51   : > { %705 = vmatprep.subr.mxu0 %v1033_v2  ;;  %v329_v22 = vld [vmem:[#allocation5 + $0x10] sm:$0xff]  ;;  %v328_v23 = vld [vmem:[#allocation5 + $0x8] sm:$0xff]  ;;  %v327_v24 = vld [vmem:[#allocation5] sm:$0xff]  ;;  %s946_s13 = sshll.u32 %s1035_s21, 4  ;;  %s947_s13 = int_to_ptr.vmem [resolvable:$false] %s946_s13 }
  0x52   : > { %706 = vmatpush3.msra.mxu0 %v340_v4  ;;  %v440_v25 = vld [vmem:[#allocation7 + $0x78] sm:$0xff]  ;;  %v439_v26 = vld [vmem:[#allocation7 + $0x70] sm:$0xff]  ;;  %v438_v27 = vld [vmem:[#allocation7 + $0x68] sm:$0xff]  ;;  %p944_p9 = pnand %p943_p8, %p1161_p7  ;;  %s948_s10 = scalar_lea.vmem %s947_s13, 256 }
  0x53   : > { %707 = vmatprep.subr.mxu0 %v1033_v2  ;;  %737 = vmatpush3.msra.mxu1 %v440_v25  ;;  %v437_v28 = vld [vmem:[#allocation7 + $0x60] sm:$0xff]  ;;  %v436_v34 = vld [vmem:[#allocation7 + $0x58] sm:$0xff]  ;;  %v435_v35 = vld [vmem:[#allocation7 + $0x50] sm:$0xff]  ;;  %p949_p2 = scmp.lt.s32.totalorder %s535_s17, %s947_s13  ;;  %p950_p13 = scmp.lt.s32.totalorder %s948_s10, %s942_s11 }
  0x54   : > { %708 = vmatpush3.msra.mxu0 %v339_v5  ;;  %738 = vmatprep.subr.mxu1 %v1033_v2  ;;  %v434_v36 = vld [vmem:[#allocation7 + $0x48] sm:$0xff]  ;;  %v433_v37 = vld [vmem:[#allocation7 + $0x40] sm:$0xff]  ;;  %v432_v38 = vld [vmem:[#allocation7 + $0x38] sm:$0xff]  ;;  %p945_p11 = pneg %p944_p9 }
  0x55   : > { %709 = vmatprep.subr.mxu0 %v1033_v2  ;;  %739 = vmatpush3.msra.mxu1 %v439_v26  ;;  %v431_v39 = vld [vmem:[#allocation7 + $0x30] sm:$0xff]  ;;  %v430_v40 = vld [vmem:[#allocation7 + $0x28] sm:$0xff]  ;;  %v429_v41 = vld [vmem:[#allocation7 + $0x20] sm:$0xff]  ;;  %p951_p0 = por %p950_p13, %p949_p2 }
  0x56   : > { %710 = vmatpush3.msra.mxu0 %v338_v6  ;;  %740 = vmatprep.subr.mxu1 %v1033_v2  ;;  %v428_v42 = vld [vmem:[#allocation7 + $0x18] sm:$0xff]  ;;  %v427_v43 = vld [vmem:[#allocation7 + $0x10] sm:$0xff]  ;;  %v426_v44 = vld [vmem:[#allocation7 + $0x8] sm:$0xff] }
  0x57   : > { %711 = vmatprep.subr.mxu0 %v1033_v2  ;;  %741 = vmatpush3.msra.mxu1 %v438_v27  ;;  %v425_v45 = vld [vmem:[#allocation7] sm:$0xff]  ;;  %v661_v46 = vld [vmem:[%s1291_s2] ss:$0 sm:$0xff]  ;;  %p952_p5 = pnand %p951_p0, %p945_p11 }
  0x58   : > { %712 = vmatpush3.msra.mxu0 %v337_v7  ;;  %742 = vmatprep.subr.mxu1 %v1033_v2  ;;  %v662_v55 = vld [vmem:[%s1293_s4] ss:$0 sm:$0xff] }
  0x59   : > { %713 = vmatprep.subr.mxu0 %v1033_v2  ;;  %743 = vmatpush3.msra.mxu1 %v437_v28 }
  0x5a   : > { %714 = vmatpush3.msra.mxu0 %v336_v15  ;;  %744 = vmatprep.subr.mxu1 %v1033_v2 }
  0x5b   : > { %715 = vmatprep.subr.mxu0 %v1033_v2  ;;  %745 = vmatpush3.msra.mxu1 %v436_v34 }
  0x5c   : > { %716 = vmatpush3.msra.mxu0 %v335_v16  ;;  %746 = vmatprep.subr.mxu1 %v1033_v2 }
  0x5d   : > { %717 = vmatprep.subr.mxu0 %v1033_v2  ;;  %747 = vmatpush3.msra.mxu1 %v435_v35 }
  0x5e   : > { %718 = vmatpush3.msra.mxu0 %v334_v17  ;;  %748 = vmatprep.subr.mxu1 %v1033_v2 }
  0x5f   : > { %719 = vmatprep.subr.mxu0 %v1033_v2  ;;  %749 = vmatpush3.msra.mxu1 %v434_v36 }
  0x60   : > { %720 = vmatpush3.msra.mxu0 %v333_v18  ;;  %750 = vmatprep.subr.mxu1 %v1033_v2 }
  0x61   : > { %721 = vmatprep.subr.mxu0 %v1033_v2  ;;  %751 = vmatpush3.msra.mxu1 %v433_v37 }
  0x62   : > { %722 = vmatpush3.msra.mxu0 %v332_v19  ;;  %752 = vmatprep.subr.mxu1 %v1033_v2 }
  0x63   : > { %723 = vmatprep.subr.mxu0 %v1033_v2  ;;  %753 = vmatpush3.msra.mxu1 %v432_v38 }
  0x64   : > { %724 = vmatpush3.msra.mxu0 %v331_v20  ;;  %754 = vmatprep.subr.mxu1 %v1033_v2 }
  0x65   : > { %725 = vmatprep.subr.mxu0 %v1033_v2  ;;  %755 = vmatpush3.msra.mxu1 %v431_v39 }
  0x66   : > { %726 = vmatpush3.msra.mxu0 %v330_v21  ;;  %756 = vmatprep.subr.mxu1 %v1033_v2 }
  0x67   : > { %727 = vmatprep.subr.mxu0 %v1033_v2  ;;  %757 = vmatpush3.msra.mxu1 %v430_v40 }
  0x68   : > { %728 = vmatpush3.msra.mxu0 %v329_v22  ;;  %758 = vmatprep.subr.mxu1 %v1033_v2 }
  0x69   : > { %729 = vmatprep.subr.mxu0 %v1033_v2  ;;  %759 = vmatpush3.msra.mxu1 %v429_v41 }
  0x6a   : > { %730 = vmatpush3.msra.mxu0 %v328_v23  ;;  %760 = vmatprep.subr.mxu1 %v1033_v2 }
  0x6b   : > { %731 = vmatprep.subr.mxu0 %v1033_v2  ;;  %761 = vmatpush3.msra.mxu1 %v428_v42 }
  0x6c   : > { %732 = vmatpush3.msra.mxu0 %v327_v24  ;;  %762 = vmatprep.subr.mxu1 %v1033_v2 }
  0x6d   : > { %763 = vmatpush3.msra.mxu1 %v427_v43 }
  0x6e   : > { %764 = vmatprep.subr.mxu1 %v1033_v2 }
  0x6f   : > { %765 = vmatpush3.msra.mxu1 %v426_v44 }
  0x70   : > { %766 = vmatprep.subr.mxu1 %v1033_v2 }
  0x71   : > { %767 = vmatpush3.msra.mxu1 %v425_v45 }
  0xd6   : > { %v313_v10 = vpop.xlane.xlu0 %312 }
  0xd7   : > { %v314_v11 = vmul.f32 0.03125, %v313_v10 }
  0xd9   : > { %v315_v12 = vsub.f32 %v1202_v0, %v314_v11 }
  0xdb   : > { %v319_v13 = vsel %vm318_vm0, %v315_v12, 0.0 }
  0xdc   : > { %v320_v14 = vmul.f32 %v319_v13, %v319_v13 }
  0xde   : > { %321 = vadd.xlane.f32.xlu0 %v320_v14 }
 0x167   : > { %v322_v29 = vpop.xlane.xlu0 %321 }
 0x168   : > { %v323_v30 = vmul.f32 0.03125, %v322_v29 }
 0x16a   : > { %v324_v31 = vadd.f32 1e-05, %v323_v30 }
 0x16c   : > { %858 = vrsqrt.f32 %v324_v31 }
 0x179   : > { %v859_v32 = vpop.eup %858 }
 0x17a   : > { %v326_v33 = vmul.f32 %v859_v32, %v319_v13 }
 0x17c   : > { %734 = vmatmul.mubr.f32.vlgmr.msra.gmra.mxu0 %v326_v33 }
 0x23c   : > { %v416_v47 = vpop.f32.mrf.mxu0 }
 0x23d   : > { %v417_v48 = vadd.f32 %v661_v46, %v416_v47 }
 0x23e   : > { %v735_v49 = vpop.f32.mrf.mxu0 }
 0x23f   : > { %v421_v50 = vmul.f32 0.70710677, %v417_v48  ;;  %v420_v52 = vmul.f32 0.5, %v417_v48 }
 0x241   : > { %860 = verf.f32 %v421_v50 }
 0x24e   : > { %v861_v51 = vpop.eup %860 }
 0x24f   : > { %v423_v53 = vadd.f32 1.0, %v861_v51 }
 0x251   : > { %v424_v54 = vmul.f32 %v423_v53, %v420_v52 }
 0x253   : > { %769 = vmatmul.mubr.f32.vlgmr.msra.gmra.mxu1 %v424_v54 }
 0x313   : > { %v514_v56 = vpop.f32.mrf.mxu1 }
 0x314   : > { %v515_v57 = vadd.f32 %v662_v55, %v514_v56 }
 0x315   : > { %v770_v58 = vpop.f32.mrf.mxu1 }
 0x316   : > { %v518_v59 = vadd.f32 %v515_v57, %v1202_v0 }
 0x318   : > { %519 = vst [vmem:[%s306_s16] sm:$0xff] %v518_v59 }
 0x319   : > { %955 = shalt.err (!%p952_p5)
}
 0x31a   : > { %s956_s1 = scalar_lea.hbm %s532_s8, 128  ;;  %s960_s28 = scalar_lea.hbm %s1294_s5, 256 }
 0x31b   : > { %p957_p10 = scmp.ne.s32.totalorder %s532_s8, %s956_s1  ;;  %p961_p6 = scmp.lt.s32.totalorder %s532_s8, %s1294_s5 }
 0x31c   : > { %p962_p12 = scmp.lt.s32.totalorder %s960_s28, %s956_s1 }
 0x31d   : > { %p958_p1 = pnand %p957_p10, %p1161_p7 }
 0x31e   : > { %p963_p3 = por %p962_p12, %p961_p6 }
 0x31f   : > { %p959_p4 = pneg %p958_p1 }
 0x321   : > { %p964_p8 = pnand %p963_p3, %p959_p4 }
 0x323   : > { %967 = shalt.err (!%p964_p8)
}
 0x324   : > { %781 = dma.vmem_to_hbm [thread:$0]  (%p1161_p7), %s535_s17, 128, %s532_s8, %s521_s6  }
 0x325 PF: > { %s546_s15 = sand.u32 1, %s1006_s18   ;;  %p1310_p9 = scmp.ne.s32.totalorder %s1302_s29, 0 }
 0x326   : > { %p1311_p11 = scmp.ge.s32.totalorder %s1026_s23, 2  ;;  %s547_s16 = scalar_lea.sflag [#allocation4], %s546_s15 }
 0x328   : > { %p795_p2 = pnand %p1311_p11, %p1310_p9 }
 0x32a   : > { %p796_p13 = pneg %p795_p2 }
 0x32c   : > { %1001 = dma.done.wait (%p796_p13), %s547_s16, 128  }
 0x32d   : > { %1003 = vsyncadd (%p796_p13), %s547_s16, 4294967168  ;;  %s22_s23 = sadd.s32 1, %s1026_s23   ;;  %s1312_s18 = smov %s1010_s19 }
 0x32e   : > { %p19_p0 = scmp.ge.s32.totalorder %s22_s23, 4   ;;  %s1313_s19 = smov %s1014_s20 }
 0x32f   : > { %s1314_s20 = smov %s1170_s12  ;;  %s1315_s21 = smov %s1022_s22 }
 0x330   : > { %s1316_s22 = smov %s1318_s25  ;;  %21 = sbr.rel (!%p19_p0) target bundleno = 9 (0x9), region = 98 }
 0x335   :  { %552 = vsyncpa [#allocation3], 1 }
 0x336   :  { %554 = vsyncpa [#allocation3 + $0x1], 1 }
 0x337   :  { %555 = vsyncpa [#allocation6], 1 }
 0x338   :  { %556 = vsyncpa [#allocation4], 1 }
 0x339   :  { %558 = vsyncpa [#allocation4 + $0x1], 1 }

// kernel: tpu_custom_call.1
= control target key start
LH: loop header
LB: loop body
LE: loop exit
PB: predicated region body
PF: predicated region fallthrough
CT: control target
= control target key end

     0   :  { %s1289_s0 = inlined_call_operand.hbm [shape: f32[16,128], index: 0, kind: input, shape index: {}]   ;;  %s1290_s1 = inlined_call_operand.hbm [shape: f32[128,128], index: 1, kind: input, shape index: {}]   ;;  %s1291_s2 = inlined_call_operand.vmem [shape: f32[1,128], index: 2, kind: input, shape index: {}]   ;;  %s1292_s3 = inlined_call_operand.hbm [shape: f32[128,128], index: 3, kind: input, shape index: {}]   ;;  %s1293_s4 = inlined_call_operand.vmem [shape: f32[1,128], index: 4, kind: input, shape index: {}]   ;;  %s1294_s5 = inlined_call_operand.hbm [shape: f32[16,128], index: 5, kind: output, shape index: {}]  }
   0x1   :  { %1298 = sst [smem:[#allocation12_spill]] %s1290_s1 }
   0x2   :  { %10 = vsyncpa [#allocation3], 0 }
   0x3   :  { %12 = vsyncpa [#allocation3 + $0x1], 0 }
   0x4   :  { %13 = vsyncpa [#allocation6], 0 }
   0x5   :  { %14 = vsyncpa [#allocation4], 0 }
   0x6   :  { %16 = vsyncpa [#allocation4 + $0x1], 0  ;;  %s1066_s18 = smov 0   ;;  %s1068_s19 = smov 0  }
   0x7   :  { %s1070_s20 = smov 0   ;;  %s1072_s21 = smov 0  }
   0x8   :  { %s1074_s22 = smov 0   ;;  %s1076_s23 = smov 0  }
   0x9 LB: > { %s647_s24 = sadd.s32 4294967295, %s1026_s23   ;;  %s648_s25 = sadd.s32 4294967294, %s1026_s23   ;;  %s1026_s23 = sphi %s1076_s23, %s22_s23   ;;  %s1022_s22 = sphi %s1074_s22, %s1316_s22   ;;  %s1018_s21 = sphi %s1072_s21, %s1315_s21   ;;  %s1014_s20 = sphi %s1070_s20, %s1314_s20   ;;  %s1010_s19 = sphi %s1068_s19, %s1313_s19   ;;  %s1006_s18 = sphi %s1066_s18, %s1312_s18  }
   0xa   : > { %p54_p0 = scmp.ne.s32.totalorder %s1010_s19, %s1006_s18  ;;  %p1100_p1 = scmp.eq.s32.totalorder %s647_s24, 0 }
   0xb   : > { %p1104_p2 = scmp.eq.s32.totalorder %s647_s24, 1  ;;  %p183_p3 = scmp.eq.s32.totalorder %s648_s25, 1 }
   0xc   : > { %s1299_s26 = scalar_select %p1100_p1, 1, 0 }
   0xd   : > { %p1110_p4 = por %p1100_p1, %p54_p0  ;;  %p649_p5 = scmp.ge.s32.totalorder %s1026_s23, 1 }
   0xe   : > { %p1115_p6 = por %p183_p3, %p54_p0  ;;  %p190_p7 = scmp.lt.s32.totalorder %s1026_s23, 3 }
   0xf   : > { %s1301_s28 = scalar_select %p1110_p4, 1, 0 }
  0x10   : > { %s1302_s29 = scalar_select %p1115_p6, 1, 0 }
  0x11   : > { %p1120_p8 = pnand %p649_p5, %p190_p7  ;;  %s1028_s6 = smov [#allocation5]  }
  0x12   : > { %s204_s7 = sshll.u32 %s1028_s6, 4  ;;  %s1029_s9 = smov [#allocation7]   ;;  %s205_s7 = int_to_ptr.vmem [resolvable:$true] %s204_s7 }
  0x13   : > { %p783_p9 = pneg %p1120_p8  ;;  %s226_s10 = sshll.u32 %s1029_s9, 4  ;;  %s227_s10 = int_to_ptr.vmem [resolvable:$true] %s226_s10 }
  0x14   : > { %s873_s11 = scalar_lea.vmem %s205_s7, 2048  ;;  %p881_p5 = scmp.lt.s32.totalorder %s205_s7, %s205_s7 }
  0x15   : > { %p1129_p11 = pnand %p783_p9, %p1100_p1  ;;  %p874_p13 = scmp.ne.s32.totalorder %s205_s7, %s873_s11 }
  0x16   : > { %p882_p7 = scmp.lt.s32.totalorder %s873_s11, %s873_s11 }
  0x17   : > { %p864_p12 = pneg %p1129_p11 }
  0x18   : > { %p883_p10 = por %p882_p7, %p881_p5 }
  0x19   : > { %p876_p0 = pnand %p874_p13, %p864_p12 }
  0x1b   : > { %p877_p3 = pneg %p876_p0 }
  0x1d   : > { %p884_p9 = pnand %p883_p10, %p877_p3 }
  0x1f   : > { %887 = shalt.err (!%p884_p9)
}
  0x20   : > { %s1030_s12 = smov 128   ;;  %s1031_s13 = smov 8  }
  0x21   : > { %s1305_s1 = sld [smem:[#allocation12_spill]]  ;;  %s899_s16 = scalar_lea.vmem %s227_s10, 2048 }
  0x22   : > { %p900_p6 = scmp.ne.s32.totalorder %s227_s10, %s899_s16  ;;  %p907_p1 = scmp.lt.s32.totalorder %s227_s10, %s227_s10 }
  0x23   : > { %p908_p4 = scmp.lt.s32.totalorder %s899_s16, %s899_s16 }
  0x24   : > { %p902_p13 = pnand %p900_p6, %p864_p12 }
  0x25   : > { %p909_p5 = por %p908_p4, %p907_p1 }
  0x26   : > { %p903_p0 = pneg %p902_p13 }
  0x27   : > { %786 = dma.hbm_to_vmem [thread:$0]  (!%p1129_p11), %s1305_s1, 2048, %s205_s7, [#allocation6], %s1030_s12, %s1030_s12, %s1031_s13  }
  0x28   : > { %p910_p10 = pnand %p909_p5, %p903_p0 }
  0x2a   : > { %913 = shalt.err (!%p910_p10)
}
  0x2b   : > { %789 = dma.hbm_to_vmem [thread:$0]  (!%p1129_p11), %s1292_s3, 2048, %s227_s10, [#allocation6], %s1030_s12, %s1030_s12, %s1031_s13  }
  0x2c   : > { %s34_s25 = sadd.s32 1, %s1022_s22  ;;  %s41_s6 = sadd.s32 1, %s1014_s20 }
  0x2d   : > { %p36_p1 = scmp.ge.s32.totalorder %s34_s25, 2  ;;  %p48_p4 = scmp.ne.s32.totalorder %s1014_s20, %s1010_s19 }
  0x2e   : > { %p49_p6 = scmp.eq.s32.totalorder %s1026_s23, 0  ;;  %p800_p12 = scmp.lt.s32.totalorder %s1026_s23, 2 }
  0x2f   : > { %s1318_s25 = smov (%p36_p1, %s34_s25), 0  ;;  %p1161_p7 = por %p1104_p2, %p48_p4 }
  0x30   : > { %p50_p3 = por %p49_p6, %p48_p4  ;;  %s38_s8 = ssub.s32 %s1022_s22, %s1318_s25 }
  0x31   : > { %s243_s9 = sand.u32 1, %s1014_s20   ;;  %p39_p9 = scmp.eq.s32.totalorder %s38_s8, 0 }
  0x32   : > { %s654_s10 = sshll.u32 %s243_s9, 3  ;;  %s655_s11 = sshll.u32 %s1022_s22, 7 }
  0x33   : > { %s1170_s12 = scalar_select %p39_p9, %s1014_s20, %s41_s6  }
  0x34   : > { %s252_s15 = scalar_lea.hbm %s1289_s0, %s655_s11  ;;  %s247_s16 = scalar_lea.vmem [#allocation2], %s654_s10 }
  0x35   : > { %s254_s17 = sshll.u32 %s247_s16, 4  ;;  %p1177_p11 = pnand %p800_p12, %p50_p3  ;;  %s255_s17 = int_to_ptr.vmem [resolvable:$true] %s254_s17 }
  0x36   : > { %s244_s24 = scalar_lea.sflag [#allocation3], %s243_s9  ;;  %s927_s8 = scalar_lea.vmem %s255_s17, 128 }
  0x37   : > { %p916_p2 = pneg %p1177_p11  ;;  %p928_p13 = scmp.ne.s32.totalorder %s255_s17, %s927_s8 }
  0x38   : > { %s1032_s6 = smov [#allocation2]  }
  0x39   : > { %p930_p0 = pnand %p928_p13, %p916_p2  ;;  %s932_s1 = sshll.u32 %s1032_s6, 4  ;;  %s933_s1 = int_to_ptr.vmem [resolvable:$false] %s932_s1 }
  0x3a   : > { %s934_s11 = scalar_lea.vmem %s933_s1, 256  ;;  %p935_p10 = scmp.lt.s32.totalorder %s255_s17, %s933_s1 }
  0x3b   : > { %p931_p5 = pneg %p930_p0  ;;  %p936_p1 = scmp.lt.s32.totalorder %s934_s11, %s927_s8 }
  0x3d   : > { %p937_p4 = por %p936_p1, %p935_p10 }
  0x3f   : > { %p938_p6 = pnand %p937_p4, %p931_p5 }
  0x41   : > { %941 = shalt.err (!%p938_p6)
}
  0x42   : > { %793 = dma.hbm_to_vmem [thread:$0]  (!%p1177_p11), %s252_s15, 128, %s255_s17, %s244_s24  }
  0x43   : > { %263 = sbr.rel (%p1120_p8) target bundleno = 805 (0x325), region = 40  ;;  %s1188_s9 = sand.u32 (!%p1120_p8), 1, %s1010_s19  }
  0x44   : > { %s657_s10 = sshll.u32 (!%p1120_p8), %s1188_s9, 3  ;;  %s266_s13 = scalar_lea.sflag (!%p1120_p8), [#allocation3], %s1188_s9 }
  0x45   : > { %s269_s1 = scalar_lea.vmem (!%p1120_p8), [#allocation2], %s657_s10  ;;  %p1308_p12 = scmp.ne.s32.totalorder (!%p1120_p8), %s1301_s28, 0 }
  0x48   : > { %993 = dma.done.wait (%p1308_p12), %s266_s13, 128  }
  0x49   : > { %995 = vsyncadd (%p1308_p12), %s266_s13, 4294967168  ;;  %p1309_p3 = scmp.ne.s32.totalorder %s1299_s26, 0 }
  0x4b   : > { %997 = dma.done.wait (%p1309_p3), [#allocation6], 4096  }
  0x4c   : > { %999 = vsyncadd (%p1309_p3), [#allocation6], 4294963200  ;;  %v1202_v0 = vld [vmem:[%s269_s1] sm:$0xff]  ;;  %v1033_v2 = vmov 0.0   ;;  %v340_v4 = vld [vmem:[#allocation5 + $0x68] sm:$0xff]  ;;  %v316_v8 = vlaneseq  ;;  %vm1034_vm1 = vmmov 0  }
  0x4d   : > { %312 = vadd.xlane.f32.xlu0 %v1202_v0  ;;  %v342_v1 = vld [vmem:[#allocation5 + $0x78] sm:$0xff]  ;;  %701 = vmatprep.subr.mxu0 %v1033_v2  ;;  %v341_v3 = vld [vmem:[#allocation5 + $0x70] sm:$0xff]  ;;  %v339_v5 = vld [vmem:[#allocation5 + $0x60] sm:$0xff]  ;;  %s664_s15 = sshll.u32 %s1018_s21, 7  ;;  %s306_s16 = scalar_lea.vmem [#allocation8], %s657_s10 }
  0x4e   : > { %736 = vmatprep.subr.mxu1 %v1033_v2  ;;  %702 = vmatpush3.msra.mxu0 %v342_v1  ;;  %v338_v6 = vld [vmem:[#allocation5 + $0x58] sm:$0xff]  ;;  %v337_v7 = vld [vmem:[#allocation5 + $0x50] sm:$0xff]  ;;  %v317_v9 = vand.u32 127, %v316_v8  ;;  %v336_v15 = vld [vmem:[#allocation5 + $0x48] sm:$0xff]  ;;  %s534_s17 = sshll.u32 %s306_s16, 4  ;;  %s532_s8 = scalar_lea.hbm %s1294_s5, %s664_s15  ;;  %s535_s17 = int_to_ptr.vmem [resolvable:$true] %s534_s17 }
  0x4f   : > { %703 = vmatprep.subr.mxu0 %v1033_v2  ;;  %v335_v16 = vld [vmem:[#allocation5 + $0x40] sm:$0xff]  ;;  %v334_v17 = vld [vmem:[#allocation5 + $0x38] sm:$0xff]  ;;  %v333_v18 = vld [vmem:[#allocation5 + $0x30] sm:$0xff]  ;;  %733 = vmatprep.mubr.msk.f32.mxu0 %vm1034_vm1, %v1033_v2  ;;  %s521_s6 = scalar_lea.sflag [#allocation4], %s1188_s9  ;;  %s942_s11 = scalar_lea.vmem %s535_s17, 128 }
  0x50   : > { %704 = vmatpush3.msra.mxu0 %v341_v3  ;;  %vm318_vm0 = vcmp.lt.s32.totalorder %v317_v9, 32  ;;  %v332_v19 = vld [vmem:[#allocation5 + $0x28] sm:$0xff]  ;;  %768 = vmatprep.mubr.msk.f32.mxu1 %vm1034_vm1, %v1033_v2  ;;  %v331_v20 = vld [vmem:[#allocation5 + $0x20] sm:$0xff]  ;;  %v330_v21 = vld [vmem:[#allocation5 + $0x18] sm:$0xff]  ;;  %p943_p8 = scmp.ne.s32.totalorder %s535_s17, %s942_s11  ;;  %s1035_s21 = smov [#allocation8]  }
  0x51   : > { %705 = vmatprep.subr.mxu0 %v1033_v2  ;;  %v329_v22 = vld [vmem:[#allocation5 + $0x10] sm:$0xff]  ;;  %v328_v23 = vld [vmem:[#allocation5 + $0x8] sm:$0xff]  ;;  %v327_v24 = vld [vmem:[#allocation5] sm:$0xff]  ;;  %s946_s13 = sshll.u32 %s1035_s21, 4  ;;  %s947_s13 = int_to_ptr.vmem [resolvable:$false] %s946_s13 }
  0x52   : > { %706 = vmatpush3.msra.mxu0 %v340_v4  ;;  %v440_v25 = vld [vmem:[#allocation7 + $0x78] sm:$0xff]  ;;  %v439_v26 = vld [vmem:[#allocation7 + $0x70] sm:$0xff]  ;;  %v438_v27 = vld [vmem:[#allocation7 + $0x68] sm:$0xff]  ;;  %p944_p9 = pnand %p943_p8, %p1161_p7  ;;  %s948_s10 = scalar_lea.vmem %s947_s13, 256 }
  0x53   : > { %707 = vmatprep.subr.mxu0 %v1033_v2  ;;  %737 = vmatpush3.msra.mxu1 %v440_v25  ;;  %v437_v28 = vld [vmem:[#allocation7 + $0x60] sm:$0xff]  ;;  %v436_v34 = vld [vmem:[#allocation7 + $0x58] sm:$0xff]  ;;  %v435_v35 = vld [vmem:[#allocation7 + $0x50] sm:$0xff]  ;;  %p949_p2 = scmp.lt.s32.totalorder %s535_s17, %s947_s13  ;;  %p950_p13 = scmp.lt.s32.totalorder %s948_s10, %s942_s11 }
  0x54   : > { %708 = vmatpush3.msra.mxu0 %v339_v5  ;;  %738 = vmatprep.subr.mxu1 %v1033_v2  ;;  %v434_v36 = vld [vmem:[#allocation7 + $0x48] sm:$0xff]  ;;  %v433_v37 = vld [vmem:[#allocation7 + $0x40] sm:$0xff]  ;;  %v432_v38 = vld [vmem:[#allocation7 + $0x38] sm:$0xff]  ;;  %p945_p11 = pneg %p944_p9 }
  0x55   : > { %709 = vmatprep.subr.mxu0 %v1033_v2  ;;  %739 = vmatpush3.msra.mxu1 %v439_v26  ;;  %v431_v39 = vld [vmem:[#allocation7 + $0x30] sm:$0xff]  ;;  %v430_v40 = vld [vmem:[#allocation7 + $0x28] sm:$0xff]  ;;  %v429_v41 = vld [vmem:[#allocation7 + $0x20] sm:$0xff]  ;;  %p951_p0 = por %p950_p13, %p949_p2 }
  0x56   : > { %710 = vmatpush3.msra.mxu0 %v338_v6  ;;  %740 = vmatprep.subr.mxu1 %v1033_v2  ;;  %v428_v42 = vld [vmem:[#allocation7 + $0x18] sm:$0xff]  ;;  %v427_v43 = vld [vmem:[#allocation7 + $0x10] sm:$0xff]  ;;  %v426_v44 = vld [vmem:[#allocation7 + $0x8] sm:$0xff] }
  0x57   : > { %711 = vmatprep.subr.mxu0 %v1033_v2  ;;  %741 = vmatpush3.msra.mxu1 %v438_v27  ;;  %v425_v45 = vld [vmem:[#allocation7] sm:$0xff]  ;;  %v661_v46 = vld [vmem:[%s1291_s2] ss:$0 sm:$0xff]  ;;  %p952_p5 = pnand %p951_p0, %p945_p11 }
  0x58   : > { %712 = vmatpush3.msra.mxu0 %v337_v7  ;;  %742 = vmatprep.subr.mxu1 %v1033_v2  ;;  %v662_v55 = vld [vmem:[%s1293_s4] ss:$0 sm:$0xff] }
  0x59   : > { %713 = vmatprep.subr.mxu0 %v1033_v2  ;;  %743 = vmatpush3.msra.mxu1 %v437_v28 }
  0x5a   : > { %714 = vmatpush3.msra.mxu0 %v336_v15  ;;  %744 = vmatprep.subr.mxu1 %v1033_v2 }
  0x5b   : > { %715 = vmatprep.subr.mxu0 %v1033_v2  ;;  %745 = vmatpush3.msra.mxu1 %v436_v34 }
  0x5c   : > { %716 = vmatpush3.msra.mxu0 %v335_v16  ;;  %746 = vmatprep.subr.mxu1 %v1033_v2 }
  0x5d   : > { %717 = vmatprep.subr.mxu0 %v1033_v2  ;;  %747 = vmatpush3.msra.mxu1 %v435_v35 }
  0x5e   : > { %718 = vmatpush3.msra.mxu0 %v334_v17  ;;  %748 = vmatprep.subr.mxu1 %v1033_v2 }
  0x5f   : > { %719 = vmatprep.subr.mxu0 %v1033_v2  ;;  %749 = vmatpush3.msra.mxu1 %v434_v36 }
  0x60   : > { %720 = vmatpush3.msra.mxu0 %v333_v18  ;;  %750 = vmatprep.subr.mxu1 %v1033_v2 }
  0x61   : > { %721 = vmatprep.subr.mxu0 %v1033_v2  ;;  %751 = vmatpush3.msra.mxu1 %v433_v37 }
  0x62   : > { %722 = vmatpush3.msra.mxu0 %v332_v19  ;;  %752 = vmatprep.subr.mxu1 %v1033_v2 }
  0x63   : > { %723 = vmatprep.subr.mxu0 %v1033_v2  ;;  %753 = vmatpush3.msra.mxu1 %v432_v38 }
  0x64   : > { %724 = vmatpush3.msra.mxu0 %v331_v20  ;;  %754 = vmatprep.subr.mxu1 %v1033_v2 }
  0x65   : > { %725 = vmatprep.subr.mxu0 %v1033_v2  ;;  %755 = vmatpush3.msra.mxu1 %v431_v39 }
  0x66   : > { %726 = vmatpush3.msra.mxu0 %v330_v21  ;;  %756 = vmatprep.subr.mxu1 %v1033_v2 }
  0x67   : > { %727 = vmatprep.subr.mxu0 %v1033_v2  ;;  %757 = vmatpush3.msra.mxu1 %v430_v40 }
  0x68   : > { %728 = vmatpush3.msra.mxu0 %v329_v22  ;;  %758 = vmatprep.subr.mxu1 %v1033_v2 }
  0x69   : > { %729 = vmatprep.subr.mxu0 %v1033_v2  ;;  %759 = vmatpush3.msra.mxu1 %v429_v41 }
  0x6a   : > { %730 = vmatpush3.msra.mxu0 %v328_v23  ;;  %760 = vmatprep.subr.mxu1 %v1033_v2 }
  0x6b   : > { %731 = vmatprep.subr.mxu0 %v1033_v2  ;;  %761 = vmatpush3.msra.mxu1 %v428_v42 }
  0x6c   : > { %732 = vmatpush3.msra.mxu0 %v327_v24  ;;  %762 = vmatprep.subr.mxu1 %v1033_v2 }
  0x6d   : > { %763 = vmatpush3.msra.mxu1 %v427_v43 }
  0x6e   : > { %764 = vmatprep.subr.mxu1 %v1033_v2 }
  0x6f   : > { %765 = vmatpush3.msra.mxu1 %v426_v44 }
  0x70   : > { %766 = vmatprep.subr.mxu1 %v1033_v2 }
  0x71   : > { %767 = vmatpush3.msra.mxu1 %v425_v45 }
  0xd6   : > { %v313_v10 = vpop.xlane.xlu0 %312 }
  0xd7   : > { %v314_v11 = vmul.f32 0.03125, %v313_v10 }
  0xd9   : > { %v315_v12 = vsub.f32 %v1202_v0, %v314_v11 }
  0xdb   : > { %v319_v13 = vsel %vm318_vm0, %v315_v12, 0.0 }
  0xdc   : > { %v320_v14 = vmul.f32 %v319_v13, %v319_v13 }
  0xde   : > { %321 = vadd.xlane.f32.xlu0 %v320_v14 }
 0x167   : > { %v322_v29 = vpop.xlane.xlu0 %321 }
 0x168   : > { %v323_v30 = vmul.f32 0.03125, %v322_v29 }
 0x16a   : > { %v324_v31 = vadd.f32 1e-05, %v323_v30 }
 0x16c   : > { %858 = vrsqrt.f32 %v324_v31 }
 0x179   : > { %v859_v32 = vpop.eup %858 }
 0x17a   : > { %v326_v33 = vmul.f32 %v859_v32, %v319_v13 }
 0x17c   : > { %734 = vmatmul.mubr.f32.vlgmr.msra.gmra.mxu0 %v326_v33 }
 0x23c   : > { %v416_v47 = vpop.f32.mrf.mxu0 }
 0x23d   : > { %v417_v48 = vadd.f32 %v661_v46, %v416_v47 }
 0x23e   : > { %v735_v49 = vpop.f32.mrf.mxu0 }
 0x23f   : > { %v421_v50 = vmul.f32 0.70710677, %v417_v48  ;;  %v420_v52 = vmul.f32 0.5, %v417_v48 }
 0x241   : > { %860 = verf.f32 %v421_v50 }
 0x24e   : > { %v861_v51 = vpop.eup %860 }
 0x24f   : > { %v423_v53 = vadd.f32 1.0, %v861_v51 }
 0x251   : > { %v424_v54 = vmul.f32 %v423_v53, %v420_v52 }
 0x253   : > { %769 = vmatmul.mubr.f32.vlgmr.msra.gmra.mxu1 %v424_v54 }
 0x313   : > { %v514_v56 = vpop.f32.mrf.mxu1 }
 0x314   : > { %v515_v57 = vadd.f32 %v662_v55, %v514_v56 }
 0x315   : > { %v770_v58 = vpop.f32.mrf.mxu1 }
 0x316   : > { %v518_v59 = vadd.f32 %v515_v57, %v1202_v0 }
 0x318   : > { %519 = vst [vmem:[%s306_s16] sm:$0xff] %v518_v59 }
 0x319   : > { %955 = shalt.err (!%p952_p5)
}
 0x31a   : > { %s956_s1 = scalar_lea.hbm %s532_s8, 128  ;;  %s960_s28 = scalar_lea.hbm %s1294_s5, 256 }
 0x31b   : > { %p957_p10 = scmp.ne.s32.totalorder %s532_s8, %s956_s1  ;;  %p961_p6 = scmp.lt.s32.totalorder %s532_s8, %s1294_s5 }
 0x31c   : > { %p962_p12 = scmp.lt.s32.totalorder %s960_s28, %s956_s1 }
 0x31d   : > { %p958_p1 = pnand %p957_p10, %p1161_p7 }
 0x31e   : > { %p963_p3 = por %p962_p12, %p961_p6 }
 0x31f   : > { %p959_p4 = pneg %p958_p1 }
 0x321   : > { %p964_p8 = pnand %p963_p3, %p959_p4 }
 0x323   : > { %967 = shalt.err (!%p964_p8)
}
 0x324   : > { %781 = dma.vmem_to_hbm [thread:$0]  (%p1161_p7), %s535_s17, 128, %s532_s8, %s521_s6  }
 0x325 PF: > { %s546_s15 = sand.u32 1, %s1006_s18   ;;  %p1310_p9 = scmp.ne.s32.totalorder %s1302_s29, 0 }
 0x326   : > { %p1311_p11 = scmp.ge.s32.totalorder %s1026_s23, 2  ;;  %s547_s16 = scalar_lea.sflag [#allocation4], %s546_s15 }
 0x328   : > { %p795_p2 = pnand %p1311_p11, %p1310_p9 }
 0x32a   : > { %p796_p13 = pneg %p795_p2 }
 0x32c   : > { %1001 = dma.done.wait (%p796_p13), %s547_s16, 128  }
 0x32d   : > { %1003 = vsyncadd (%p796_p13), %s547_s16, 4294967168  ;;  %s22_s23 = sadd.s32 1, %s1026_s23   ;;  %s1312_s18 = smov %s1010_s19 }
 0x32e   : > { %p19_p0 = scmp.ge.s32.totalorder %s22_s23, 4   ;;  %s1313_s19 = smov %s1014_s20 }
 0x32f   : > { %s1314_s20 = smov %s1170_s12  ;;  %s1315_s21 = smov %s1022_s22 }
 0x330   : > { %s1316_s22 = smov %s1318_s25  ;;  %21 = sbr.rel (!%p19_p0) target bundleno = 9 (0x9), region = 98 }
 0x335   :  { %552 = vsyncpa [#allocation3], 1 }
 0x336   :  { %554 = vsyncpa [#allocation3 + $0x1], 1 }
 0x337   :  { %555 = vsyncpa [#allocation6], 1 }
 0x338   :  { %556 = vsyncpa [#allocation4], 1 }
 0x339   :  { %558 = vsyncpa [#allocation4 + $0x1], 1 }

</bundles_post_ra>
